<compile_context>
chip_gen: v7x
topology: tpu7x:2x2x1
jax: 0.10.0
libtpu: 0.0.40
codegen_flags: <defaults>
</compile_context>

<pallas_src>
import jax
import jax.numpy as jnp
from jax.experimental import pallas as pl
from jax.experimental.pallas import tpu as pltpu


def _silu(v):
    # silu(v) = v * sigmoid(v), with a stable sigmoid:
    #   sigmoid(v) = s            for v >= 0, s = 1 / (1 + exp(-|v|))
    #   sigmoid(v) = 1 - s        for v <  0
    # exp -> EUP, approximate reciprocal -> EUP (vrcp); select/abs -> VPU.
    e = jnp.exp(-jnp.abs(v))                       # never overflows
    s = pl.reciprocal(1.0 + e, approx=True)
    sig = jnp.where(v >= 0, s, 1.0 - s)
    return v * sig


def mlp_backbone_kernel(
    x_ref,            # (TILE_B, D) bf16   streamed input tile
    w1_ref, b1_ref,   # (D, H) bf16, (1, H) f32    resident
    w2_ref, b2_ref,   # (H, H) f32,  (1, H) f32    resident
    w3_ref, b3_ref,   # (H, H) f32,  (1, H) f32    resident
    w4_ref,           # (1, H) f32                 resident (fc4 weight row)
    b4_ref,           # (1, 1) f32                 SMEM scalar
    o_ref,            # (1, TILE_B) f32            lane-dense output row
):
    x = x_ref[...]                                   # bf16

    # fc1: bf16 x bf16 on the MXU, f32 accumulation; everything after is f32.
    h = _silu(jnp.dot(x, w1_ref[...], preferred_element_type=jnp.float32)
              + b1_ref[...])
    h = _silu(jnp.dot(h, w2_ref[...], preferred_element_type=jnp.float32)
              + b2_ref[...])
    h = _silu(jnp.dot(h, w3_ref[...], preferred_element_type=jnp.float32)
              + b3_ref[...])

    # fc4 (H -> 1): VPU multiply + XLU lane reduction, written as a lane-dense
    # (1, TILE_B) row so the store and writeback DMA are unmasked/contiguous.
    vec = jnp.sum(h * w4_ref[...], axis=-1) + b4_ref[0, 0]      # (TILE_B,)
    o_ref[0, :] = vec.astype(o_ref.dtype)


def _round_up(n, m):
    return ((n + m - 1) // m) * m


def _cdiv(a, b):
    return -(-a // b)


def _choose_tile_b(B, tile_b):
    """Pick a batch tile that satisfies the TPU tiling rules.

    * Single tile for small batches: rows rounded up to the bf16 sublane pack
      (16); the lane-dense out block then equals the full output width.
    * Otherwise the tile is a multiple of 128 so the (1, TILE_B) output block
      obeys the 128-lane divisibility rule (and the input sublane rule).
    * Guarantee >= 2 grid steps once B >= 256 so both v7x TensorCores get work.
    """
    b16 = _round_up(B, 16)
    if b16 <= tile_b and B < 256:
        return b16
    tb = min(tile_b, _round_up(B, 128))
    tb = max(128, (tb // 128) * 128)
    if _cdiv(B, tb) < 2 and B >= 256:
        tb = _round_up(_cdiv(B, 2), 128)
    return tb


def mlp_backbone_forward(x, params, *, tile_b=1024):
    """x: (B, C, H, W) float32.  Returns (B, 1) float32."""
    B = x.shape[0]
    w1, b1, w2, b2, w3, b3, w4, b4 = params
    D, H = w1.shape

    x_flat = x.reshape(B, -1)                 # == torch.flatten(x, 1)
    assert x_flat.shape[1] == D, (x_flat.shape, w1.shape)

    # bf16 stream for the HBM-bound fc1 read (f32 accumulation in-kernel).
    x_bf = x_flat.astype(jnp.bfloat16)
    w1_bf = w1.astype(jnp.bfloat16)

    tb = _choose_tile_b(B, tile_b)
    num_tiles = _cdiv(B, tb)
    bp = num_tiles * tb                       # padded lane width of the output

    w4_row = w4.reshape(1, H).astype(jnp.float32)   # fc4 weight as a lane row
    b4_s = b4.reshape(1, 1).astype(jnp.float32)     # fc4 bias as an SMEM scalar

    def resident(shape):
        # Same block every grid step -> stays in VMEM across the whole loop.
        return pl.BlockSpec(shape, lambda i: (0, 0))

    # Advisory cost estimate so XLA schedules the surrounding flatten/cast/
    # slice sensibly around the custom call.
    flops = 2 * B * (D * H + 2 * H * H + H)
    transcendentals = 3 * B * H
    bytes_accessed = (B * D * 2 + B * 4
                      + D * H * 2 + 2 * H * H * 4 + (3 * H + 1) * 4)
    cost = pl.CostEstimate(flops=flops, transcendentals=transcendentals,
                           bytes_accessed=bytes_accessed)

    # Double-buffered VMEM estimate; bump the scoped limit only when a large
    # tile actually needs it (v5e's default scoped limit is 16 MiB).
    vmem_est = 2 * (tb * D * 2 + tb * 4) \
        + 2 * (D * H * 2 + 2 * H * H * 4 + (3 * H + 1) * 4)
    cp_kwargs = {}
    if vmem_est > 14 * 1024 * 1024:
        cp_kwargs["vmem_limit_bytes"] = int(vmem_est + (4 << 20))

    out = pl.pallas_call(
        mlp_backbone_kernel,
        out_shape=jax.ShapeDtypeStruct((1, bp), jnp.float32),
        grid=(num_tiles,),
        in_specs=[
            pl.BlockSpec((tb, D), lambda i: (i, 0)),            # x (pipelined)
            resident((D, H)), resident((1, H)),                 # fc1
            resident((H, H)), resident((1, H)),                 # fc2
            resident((H, H)), resident((1, H)),                 # fc3
            resident((1, H)),                                   # fc4 weight
            pl.BlockSpec(memory_space=pltpu.MemorySpace.SMEM),  # fc4 bias
        ],
        out_specs=pl.BlockSpec((1, tb), lambda i: (0, i)),       # lane-dense
        compiler_params=pltpu.CompilerParams(
            dimension_semantics=("parallel",),                   # v7x: 2 TCs
            **cp_kwargs),
        cost_estimate=cost,
    )(x_bf, w1_bf, b1, w2, b2, w3, b3, w4_row, b4_s)

    return out[0, :B].reshape(B, 1)


def init_params(key, input_shape, hidden_size):
    """Deterministic init matching nn.Linear shapes (weights stored transposed:
    (in, out) so the kernel can do x @ W)."""
    d_in = 1
    for s in input_shape:
        d_in *= s

    dims = [(d_in, hidden_size),
            (hidden_size, hidden_size),
            (hidden_size, hidden_size),
            (hidden_size, 1)]

    params = []
    for (fi, fo) in dims:
        key, kw, kb = jax.random.split(key, 3)
        bound = 1.0 / (fi ** 0.5)  # PyTorch default Linear init range
        w = jax.random.uniform(kw, (fi, fo), jnp.float32, -bound, bound)
        b = jax.random.uniform(kb, (1, fo), jnp.float32, -bound, bound)
        params.extend([w, b])
    return tuple(params)


def reference_forward(x, params):
    """Plain-JAX f32 reference (exact PyTorch-module semantics)."""
    w1, b1, w2, b2, w3, b3, w4, b4 = params
    h = x.reshape(x.shape[0], -1)
    h = jax.nn.silu(h @ w1 + b1)
    h = jax.nn.silu(h @ w2 + b2)
    h = jax.nn.silu(h @ w3 + b3)
    return h @ w4 + b4


def reference_forward_bf16_fc1(x, params):
    """Reference with the same bf16 fc1 quantization the kernel uses (isolates
    kernel-implementation error from the intentional bf16 cast)."""
    w1, b1, w2, b2, w3, b3, w4, b4 = params
    h = x.reshape(x.shape[0], -1).astype(jnp.bfloat16)
    h = jnp.dot(h, w1.astype(jnp.bfloat16),
                preferred_element_type=jnp.float32) + b1
    h = jax.nn.silu(h)
    h = jax.nn.silu(h @ w2 + b2)
    h = jax.nn.silu(h @ w3 + b3)
    return h @ w4 + b4


if __name__ == "__main__":
    # Small shapes consistent with the module: input_shape=(4,16,16), hidden=32.
    batch = 2
    input_shape = (4, 16, 16)
    hidden_size = 32

    key = jax.random.PRNGKey(0)
    kx, kp = jax.random.split(key)
    x = jax.random.normal(kx, (batch,) + input_shape, dtype=jnp.float32)
    params = init_params(kp, input_shape, hidden_size)

    out = jax.block_until_ready(mlp_backbone_forward(x, params))
    assert out.shape == (batch, 1), out.shape
    # Tight check vs a bf16-fc1-matched reference (residual error is only the
    # approximate EUP reciprocal in the in-kernel sigmoid).
    ref_bf = reference_forward_bf16_fc1(x, params)
    assert jnp.allclose(out, ref_bf, atol=1e-2, rtol=1e-2), (out, ref_bf)
    # Looser check vs the exact f32 PyTorch-semantics reference (bf16 fc1
    # quantization is the dominant, intentional difference).
    ref_f32 = reference_forward(x, params)
    assert jnp.allclose(out, ref_f32, atol=3e-2, rtol=3e-2), (out, ref_f32)

    # Exercise the multi-tile grid path with a partial last block
    # (B=300 with TILE_B=128 -> 3 grid steps, last block 44 valid rows).
    batch2 = 300
    kx2, _ = jax.random.split(kx)
    x2 = jax.random.normal(kx2, (batch2,) + input_shape, dtype=jnp.float32)
    out2 = jax.block_until_ready(mlp_backbone_forward(x2, params, tile_b=128))
    assert out2.shape == (batch2, 1), out2.shape
    ref2 = reference_forward_bf16_fc1(x2, params)
    assert jnp.allclose(out2, ref2, atol=1e-2, rtol=1e-2), (out2, ref2)

    print("KERNEL_OK")
</pallas_src>

<mosaic_0001>
module attributes {stable_mosaic.version = 11 : i64} {
  func.func @mlp_backbone_kernel(%arg0: i32, %arg1: memref<16x1024xbf16, #tpu.memory_space<vmem>>, %arg2: memref<1024x32xbf16, #tpu.memory_space<vmem>>, %arg3: memref<1x32xf32, #tpu.memory_space<vmem>>, %arg4: memref<32x32xf32, #tpu.memory_space<vmem>>, %arg5: memref<1x32xf32, #tpu.memory_space<vmem>>, %arg6: memref<32x32xf32, #tpu.memory_space<vmem>>, %arg7: memref<1x32xf32, #tpu.memory_space<vmem>>, %arg8: memref<1x32xf32, #tpu.memory_space<vmem>>, %arg9: memref<1x1xf32, #tpu.memory_space<smem>>, %arg10: memref<1x16xf32, #tpu.memory_space<vmem>>) attributes {dimension_semantics = [#tpu.dimension_semantics<parallel>], iteration_bounds = array<i64: 1>, scalar_prefetch = 0 : i64, scratch_operands = 0 : i64, tpu.core_type = #tpu.core_type<tc>, window_params = [{transform_indices = @transform_0, window_bounds = array<i64: 16, 1024>}, {pipeline_mode = #tpu.pipeline_mode<synchronous>, transform_indices = @transform_1, window_bounds = array<i64: 1024, 32>}, {pipeline_mode = #tpu.pipeline_mode<synchronous>, transform_indices = @transform_2, window_bounds = array<i64: 1, 32>}, {pipeline_mode = #tpu.pipeline_mode<synchronous>, transform_indices = @transform_3, window_bounds = array<i64: 32, 32>}, {pipeline_mode = #tpu.pipeline_mode<synchronous>, transform_indices = @transform_4, window_bounds = array<i64: 1, 32>}, {pipeline_mode = #tpu.pipeline_mode<synchronous>, transform_indices = @transform_5, window_bounds = array<i64: 32, 32>}, {pipeline_mode = #tpu.pipeline_mode<synchronous>, transform_indices = @transform_6, window_bounds = array<i64: 1, 32>}, {pipeline_mode = #tpu.pipeline_mode<synchronous>, transform_indices = @transform_7, window_bounds = array<i64: 1, 32>}, {transform_indices = @transform_8, window_bounds = array<i64: 1, 1>}, {transform_indices = @transform_9, window_bounds = array<i64: 1, 16>}]} {
    %c0 = arith.constant 0 : index
    %c0_0 = arith.constant 0 : index
    %0 = vector.load %arg1[%c0, %c0_0] : memref<16x1024xbf16, #tpu.memory_space<vmem>>, vector<16x1024xbf16>
    %c0_1 = arith.constant 0 : index
    %c0_2 = arith.constant 0 : index
    %1 = vector.load %arg2[%c0_1, %c0_2] : memref<1024x32xbf16, #tpu.memory_space<vmem>>, vector<1024x32xbf16>
    %cst = arith.constant dense<0.000000e+00> : vector<16x32xf32>
    %2 = tpu.matmul %0, %1, %cst {dimension_numbers = #tpu.dot_dimension_numbers<[1], [0], [0], [1], [0, 0, 1, 1], [], []>} : vector<16x1024xbf16>, vector<1024x32xbf16>, vector<16x32xf32> -> vector<16x32xf32>
    %c0_3 = arith.constant 0 : index
    %c0_4 = arith.constant 0 : index
    %3 = vector.load %arg3[%c0_3, %c0_4] : memref<1x32xf32, #tpu.memory_space<vmem>>, vector<1x32xf32>
    %4 = vector.broadcast %3 : vector<1x32xf32> to vector<16x32xf32>
    %5 = arith.addf %2, %4 : vector<16x32xf32>
    %6 = math.absf %5 : vector<16x32xf32>
    %cst_5 = arith.constant 0.000000e+00 : f32
    %7 = vector.broadcast %cst_5 : f32 to vector<16x32xf32>
    %8 = arith.subf %7, %6 : vector<16x32xf32>
    %9 = math.exp %8 : vector<16x32xf32>
    %cst_6 = arith.constant 1.000000e+00 : f32
    %10 = vector.broadcast %cst_6 : f32 to vector<16x32xf32>
    %11 = arith.addf %10, %9 : vector<16x32xf32>
    %12 = tpu.reciprocal %11 {approx = true} : vector<16x32xf32> -> vector<16x32xf32>
    %cst_7 = arith.constant 0.000000e+00 : f32
    %13 = vector.broadcast %cst_7 : f32 to vector<16x32xf32>
    %14 = arith.cmpf oge, %5, %13 : vector<16x32xf32>
    %cst_8 = arith.constant 1.000000e+00 : f32
    %15 = vector.broadcast %cst_8 : f32 to vector<16x32xf32>
    %16 = arith.subf %15, %12 : vector<16x32xf32>
    %17 = arith.select %14, %12, %16 : vector<16x32xi1>, vector<16x32xf32>
    %18 = arith.mulf %5, %17 : vector<16x32xf32>
    %c0_9 = arith.constant 0 : index
    %c0_10 = arith.constant 0 : index
    %19 = vector.load %arg4[%c0_9, %c0_10] : memref<32x32xf32, #tpu.memory_space<vmem>>, vector<32x32xf32>
    %cst_11 = arith.constant dense<0.000000e+00> : vector<16x32xf32>
    %20 = tpu.matmul %18, %19, %cst_11 {dimension_numbers = #tpu.dot_dimension_numbers<[1], [0], [0], [1], [0, 0, 1, 1], [], []>} : vector<16x32xf32>, vector<32x32xf32>, vector<16x32xf32> -> vector<16x32xf32>
    %c0_12 = arith.constant 0 : index
    %c0_13 = arith.constant 0 : index
    %21 = vector.load %arg5[%c0_12, %c0_13] : memref<1x32xf32, #tpu.memory_space<vmem>>, vector<1x32xf32>
    %22 = vector.broadcast %21 : vector<1x32xf32> to vector<16x32xf32>
    %23 = arith.addf %20, %22 : vector<16x32xf32>
    %24 = math.absf %23 : vector<16x32xf32>
    %cst_14 = arith.constant 0.000000e+00 : f32
    %25 = vector.broadcast %cst_14 : f32 to vector<16x32xf32>
    %26 = arith.subf %25, %24 : vector<16x32xf32>
    %27 = math.exp %26 : vector<16x32xf32>
    %cst_15 = arith.constant 1.000000e+00 : f32
    %28 = vector.broadcast %cst_15 : f32 to vector<16x32xf32>
    %29 = arith.addf %28, %27 : vector<16x32xf32>
    %30 = tpu.reciprocal %29 {approx = true} : vector<16x32xf32> -> vector<16x32xf32>
    %cst_16 = arith.constant 0.000000e+00 : f32
    %31 = vector.broadcast %cst_16 : f32 to vector<16x32xf32>
    %32 = arith.cmpf oge, %23, %31 : vector<16x32xf32>
    %cst_17 = arith.constant 1.000000e+00 : f32
    %33 = vector.broadcast %cst_17 : f32 to vector<16x32xf32>
    %34 = arith.subf %33, %30 : vector<16x32xf32>
    %35 = arith.select %32, %30, %34 : vector<16x32xi1>, vector<16x32xf32>
    %36 = arith.mulf %23, %35 : vector<16x32xf32>
    %c0_18 = arith.constant 0 : index
    %c0_19 = arith.constant 0 : index
    %37 = vector.load %arg6[%c0_18, %c0_19] : memref<32x32xf32, #tpu.memory_space<vmem>>, vector<32x32xf32>
    %cst_20 = arith.constant dense<0.000000e+00> : vector<16x32xf32>
    %38 = tpu.matmul %36, %37, %cst_20 {dimension_numbers = #tpu.dot_dimension_numbers<[1], [0], [0], [1], [0, 0, 1, 1], [], []>} : vector<16x32xf32>, vector<32x32xf32>, vector<16x32xf32> -> vector<16x32xf32>
    %c0_21 = arith.constant 0 : index
    %c0_22 = arith.constant 0 : index
    %39 = vector.load %arg7[%c0_21, %c0_22] : memref<1x32xf32, #tpu.memory_space<vmem>>, vector<1x32xf32>
    %40 = vector.broadcast %39 : vector<1x32xf32> to vector<16x32xf32>
    %41 = arith.addf %38, %40 : vector<16x32xf32>
    %42 = math.absf %41 : vector<16x32xf32>
    %cst_23 = arith.constant 0.000000e+00 : f32
    %43 = vector.broadcast %cst_23 : f32 to vector<16x32xf32>
    %44 = arith.subf %43, %42 : vector<16x32xf32>
    %45 = math.exp %44 : vector<16x32xf32>
    %cst_24 = arith.constant 1.000000e+00 : f32
    %46 = vector.broadcast %cst_24 : f32 to vector<16x32xf32>
    %47 = arith.addf %46, %45 : vector<16x32xf32>
    %48 = tpu.reciprocal %47 {approx = true} : vector<16x32xf32> -> vector<16x32xf32>
    %cst_25 = arith.constant 0.000000e+00 : f32
    %49 = vector.broadcast %cst_25 : f32 to vector<16x32xf32>
    %50 = arith.cmpf oge, %41, %49 : vector<16x32xf32>
    %cst_26 = arith.constant 1.000000e+00 : f32
    %51 = vector.broadcast %cst_26 : f32 to vector<16x32xf32>
    %52 = arith.subf %51, %48 : vector<16x32xf32>
    %53 = arith.select %50, %48, %52 : vector<16x32xi1>, vector<16x32xf32>
    %54 = arith.mulf %41, %53 : vector<16x32xf32>
    %c0_27 = arith.constant 0 : index
    %c0_28 = arith.constant 0 : index
    %55 = vector.load %arg8[%c0_27, %c0_28] : memref<1x32xf32, #tpu.memory_space<vmem>>, vector<1x32xf32>
    %56 = vector.broadcast %55 : vector<1x32xf32> to vector<16x32xf32>
    %57 = arith.mulf %54, %56 : vector<16x32xf32>
    %cst_29 = arith.constant dense<0.000000e+00> : vector<16xf32>
    %58 = vector.multi_reduction <add>, %57, %cst_29 [1] : vector<16x32xf32> to vector<16xf32>
    %c0_30 = arith.constant 0 : index
    %c0_31 = arith.constant 0 : index
    %59 = memref.load %arg9[%c0_30, %c0_31] : memref<1x1xf32, #tpu.memory_space<smem>>
    %60 = vector.broadcast %59 : f32 to vector<16xf32>
    %61 = arith.addf %58, %60 : vector<16xf32>
    %c0_32 = arith.constant 0 : index
    %c0_33 = arith.constant 0 : index
    %62 = vector.load %arg10[%c0_32, %c0_33] : memref<1x16xf32, #tpu.memory_space<vmem>>, vector<1x16xf32>
    %63 = vector.shape_cast %62 : vector<1x16xf32> to vector<16xf32>
    %64 = vector.shape_cast %61 : vector<16xf32> to vector<1x16xf32>
    tpu.vector_store %arg10[%c0_32, %c0_33], %64 {strides = array<i32>} : memref<1x16xf32, #tpu.memory_space<vmem>>, vector<1x16xf32>,
    return
  }
  func.func @transform_0(%arg0: i32) -> (i32, i32) {
    %c0_i32 = arith.constant 0 : i32
    %c0_i32_0 = arith.constant 0 : i32
    return %arg0, %c0_i32 : i32, i32
  }
  func.func @transform_1(%arg0: i32) -> (i32, i32) {
    %c0_i32 = arith.constant 0 : i32
    %c0_i32_0 = arith.constant 0 : i32
    %c0_i32_1 = arith.constant 0 : i32
    return %c0_i32, %c0_i32_0 : i32, i32
  }
  func.func @transform_2(%arg0: i32) -> (i32, i32) {
    %c0_i32 = arith.constant 0 : i32
    %c0_i32_0 = arith.constant 0 : i32
    %c0_i32_1 = arith.constant 0 : i32
    return %c0_i32, %c0_i32_0 : i32, i32
  }
  func.func @transform_3(%arg0: i32) -> (i32, i32) {
    %c0_i32 = arith.constant 0 : i32
    %c0_i32_0 = arith.constant 0 : i32
    %c0_i32_1 = arith.constant 0 : i32
    return %c0_i32, %c0_i32_0 : i32, i32
  }
  func.func @transform_4(%arg0: i32) -> (i32, i32) {
    %c0_i32 = arith.constant 0 : i32
    %c0_i32_0 = arith.constant 0 : i32
    %c0_i32_1 = arith.constant 0 : i32
    return %c0_i32, %c0_i32_0 : i32, i32
  }
  func.func @transform_5(%arg0: i32) -> (i32, i32) {
    %c0_i32 = arith.constant 0 : i32
    %c0_i32_0 = arith.constant 0 : i32
    %c0_i32_1 = arith.constant 0 : i32
    return %c0_i32, %c0_i32_0 : i32, i32
  }
  func.func @transform_6(%arg0: i32) -> (i32, i32) {
    %c0_i32 = arith.constant 0 : i32
    %c0_i32_0 = arith.constant 0 : i32
    %c0_i32_1 = arith.constant 0 : i32
    return %c0_i32, %c0_i32_0 : i32, i32
  }
  func.func @transform_7(%arg0: i32) -> (i32, i32) {
    %c0_i32 = arith.constant 0 : i32
    %c0_i32_0 = arith.constant 0 : i32
    %c0_i32_1 = arith.constant 0 : i32
    return %c0_i32, %c0_i32_0 : i32, i32
  }
  func.func @transform_8(%arg0: i32) -> (i32, i32) {
    %c0_i32 = arith.constant 0 : i32
    %c0_i32_0 = arith.constant 0 : i32
    %c0_i32_1 = arith.constant 0 : i32
    return %c0_i32, %c0_i32_0 : i32, i32
  }
  func.func @transform_9(%arg0: i32) -> (i32, i32) {
    %c0_i32 = arith.constant 0 : i32
    %c0_i32_0 = arith.constant 0 : i32
    return %c0_i32, %arg0 : i32, i32
  }
}

</mosaic_0001>

<bundles_post_ra>
// kernel: tpu_custom_call.1
= control target key start
LH: loop header
LB: loop body
LE: loop exit
PB: predicated region body
PF: predicated region fallthrough
CT: control target
= control target key end

     0   :  { %v197_v30 = vlaneseq  ;;  %v1510_v33 = vmov 1966171168   ;;  %s1876_s0 = inlined_call_operand.vmem [shape: bf16[2,1024], index: 0, kind: input, shape index: {}]   ;;  %s1877_s1 = inlined_call_operand.vmem [shape: bf16[1024,32], index: 1, kind: input, shape index: {}]   ;;  %s1878_s2 = inlined_call_operand.vmem [shape: f32[1,32], index: 2, kind: input, shape index: {}]   ;;  %s1879_s3 = inlined_call_operand.vmem [shape: f32[32,32], index: 3, kind: input, shape index: {}]   ;;  %s1880_s4 = inlined_call_operand.vmem [shape: f32[1,32], index: 4, kind: input, shape index: {}]   ;;  %s1881_s5 = inlined_call_operand.vmem [shape: f32[32,32], index: 5, kind: input, shape index: {}]   ;;  %s1882_s6 = inlined_call_operand.vmem [shape: f32[1,32], index: 6, kind: input, shape index: {}]   ;;  %s1883_s7 = inlined_call_operand.vmem [shape: f32[1,32], index: 7, kind: input, shape index: {}]   ;;  %s1884_s8 = inlined_call_operand.<no memory space> [shape: f32[1,1], index: 8, kind: input, shape index: {}]   ;;  %s1885_s9 = inlined_call_operand.hbm [shape: f32[1,16], index: 9, kind: output, shape index: {}]  }
   0x1   :  { %v1386_v0 = vld [vmem:[%s1877_s1 + $0x40] sm:$0xff]   ;;  %v1390_v4 = vld [vmem:[%s1877_s1 + $0x48] sm:$0xff]   ;;  %v1394_v8 = vld [vmem:[%s1877_s1 + $0x50] sm:$0xff]   ;;  %v195_v34 = vunpack.c.l.s4 %v1510_v33 }
   0x2   :  { %v1387_v1 = vld [vmem:[%s1877_s1 + $0xc0] sm:$0xff]   ;;  %1246 = vmatprep.subr.bf16.mxu0 %v1386_v0  ;;  %v1391_v5 = vld [vmem:[%s1877_s1 + $0xc8] sm:$0xff]   ;;  %v1395_v9 = vld [vmem:[%s1877_s1 + $0xd0] sm:$0xff]   ;;  %v1659_v35 = vshrl.u32 %v197_v30, 7 }
   0x3   :  { %v1388_v2 = vld [vmem:[%s1877_s1] sm:$0xff]   ;;  %1268 = vmatprep.subr.bf16.mxu1 %v1387_v1  ;;  %v1392_v6 = vld [vmem:[%s1877_s1 + $0x8] sm:$0xff]   ;;  %v1396_v10 = vld [vmem:[%s1877_s1 + $0x10] sm:$0xff]   ;;  %v196_v40 = vunpack.c.0.s8 %v195_v34 }
   0x4   :  { %v1389_v3 = vld [vmem:[%s1877_s1 + $0x80] sm:$0xff]   ;;  %1247 = vmatpush3.bf16.msra.mxu0 %v1388_v2  ;;  %v1393_v7 = vld [vmem:[%s1877_s1 + $0x88] sm:$0xff]   ;;  %v1397_v11 = vld [vmem:[%s1877_s1 + $0x90] sm:$0xff]  }
   0x5   :  { %1269 = vmatpush3.bf16.msra.mxu1 %v1389_v3  ;;  %1248 = vmatprep.subr.bf16.mxu0 %v1390_v4  ;;  %v1398_v12 = vld [vmem:[%s1877_s1 + $0x58] sm:$0xff]   ;;  %v1402_v16 = vld [vmem:[%s1877_s1 + $0x60] sm:$0xff]   ;;  %v1406_v20 = vld [vmem:[%s1877_s1 + $0x68] sm:$0xff]   ;;  %v1686_v45 = vsub.s32 %v196_v40, %v1659_v35 }
   0x6   :  { %1270 = vmatprep.subr.bf16.mxu1 %v1391_v5  ;;  %v1399_v13 = vld [vmem:[%s1877_s1 + $0xd8] sm:$0xff]   ;;  %v1403_v17 = vld [vmem:[%s1877_s1 + $0xe0] sm:$0xff]   ;;  %v1407_v21 = vld [vmem:[%s1877_s1 + $0xe8] sm:$0xff]  }
   0x7   :  { %v1400_v14 = vld [vmem:[%s1877_s1 + $0x18] sm:$0xff]   ;;  %v1404_v18 = vld [vmem:[%s1877_s1 + $0x20] sm:$0xff]   ;;  %v1408_v22 = vld [vmem:[%s1877_s1 + $0x28] sm:$0xff]  }
   0x8   :  { %1249 = vmatpush3.bf16.msra.mxu0 %v1392_v6  ;;  %v1401_v15 = vld [vmem:[%s1877_s1 + $0x98] sm:$0xff]   ;;  %v1405_v19 = vld [vmem:[%s1877_s1 + $0xa0] sm:$0xff]   ;;  %v1409_v23 = vld [vmem:[%s1877_s1 + $0xa8] sm:$0xff]  }
   0x9   :  { %1271 = vmatpush3.bf16.msra.mxu1 %v1393_v7  ;;  %1250 = vmatprep.subr.bf16.mxu0 %v1394_v8  ;;  %v1410_v24 = vld [vmem:[%s1877_s1 + $0x70] sm:$0xff]   ;;  %v1414_v28 = vld [vmem:[%s1877_s1 + $0x78] sm:$0xff]   ;;  %v1418_v36 = vld [vmem:[%s1876_s0] ss:$8 sps:$4 sm:$0xff]  }
   0xa   :  { %1272 = vmatprep.subr.bf16.mxu1 %v1395_v9  ;;  %v1411_v25 = vld [vmem:[%s1877_s1 + $0xf0] sm:$0xff]   ;;  %v1415_v29 = vld [vmem:[%s1877_s1 + $0xf8] sm:$0xff]   ;;  %v1420_v37 = vld [vmem:[%s1876_s0 + $0x4] ss:$8 sps:$4 sm:$0xff]   ;;  %v200_v47 = vrot.slane %v1418_v36, %v1686_v45 }
   0xb   :  { %v1412_v26 = vld [vmem:[%s1877_s1 + $0x30] sm:$0xff]   ;;  %v1416_v31 = vld [vmem:[%s1877_s1 + $0x38] sm:$0xff]   ;;  %v1424_v41 = vld [vmem:[%s1876_s0 + $0x20] ss:$8 sps:$4 sm:$0xff]   ;;  %v1699_v52 = vrot.slane %v1420_v37, %v1686_v45 }
   0xc   :  { %1251 = vmatpush3.bf16.msra.mxu0 %v1396_v10  ;;  %v1413_v27 = vld [vmem:[%s1877_s1 + $0xb0] sm:$0xff]   ;;  %v1417_v32 = vld [vmem:[%s1877_s1 + $0xb8] sm:$0xff]   ;;  %v1426_v42 = vld [vmem:[%s1876_s0 + $0x24] ss:$8 sps:$4 sm:$0xff]   ;;  %v228_v49 = vrot.slane %v1424_v41, %v1686_v45 }
   0xd   :  { %1273 = vmatpush3.bf16.msra.mxu1 %v1397_v11  ;;  %1252 = vmatprep.subr.bf16.mxu0 %v1398_v12  ;;  %v1421_v38 = vld [vmem:[%s1876_s0 + $0x10] ss:$8 sps:$4 sm:$0xff]   ;;  %v1423_v39 = vld [vmem:[%s1876_s0 + $0x14] ss:$8 sps:$4 sm:$0xff]   ;;  %v1430_v46 = vld [vmem:[%s1877_s1 + $0x140] sm:$0xff]   ;;  %v1705_v54 = vrot.slane %v1426_v42, %v1686_v45 }
   0xe   :  { %1274 = vmatprep.subr.bf16.mxu1 %v1399_v13  ;;  %v1427_v43 = vld [vmem:[%s1876_s0 + $0x30] ss:$8 sps:$4 sm:$0xff]   ;;  %v1429_v44 = vld [vmem:[%s1876_s0 + $0x34] ss:$8 sps:$4 sm:$0xff]   ;;  %v214_v48 = vrot.slane %v1421_v38, %v1686_v45  ;;  %v1431_v51 = vld [vmem:[%s1877_s1 + $0x1c0] sm:$0xff]   ;;  %v1702_v53 = vrot.slane %v1423_v39, %v1686_v45 }
   0xf   :  { %v242_v50 = vrot.slane %v1427_v43, %v1686_v45  ;;  %v1708_v55 = vrot.slane %v1429_v44, %v1686_v45  ;;  %v1432_v2 = vld [vmem:[%s1877_s1 + $0x100] sm:$0xff]   ;;  %v1434_v10 = vld [vmem:[%s1877_s1 + $0x148] sm:$0xff]   ;;  %v1454_v33 = vld [vmem:[%s1877_s1 + $0x170] sm:$0xff]  }
  0x10   :  { %1253 = vmatpush3.bf16.msra.mxu0 %v1400_v14  ;;  %v251_v56 = vcombine.high %v200_v47, %v214_v48  ;;  %v250_v58 = vcombine.low %v200_v47, %v214_v48  ;;  %v253_v60 = vcombine.high %v1699_v52, %v1702_v53  ;;  %v1433_v3 = vld [vmem:[%s1877_s1 + $0x180] sm:$0xff]   ;;  %v1435_v11 = vld [vmem:[%s1877_s1 + $0x1c8] sm:$0xff]   ;;  %v1455_v34 = vld [vmem:[%s1877_s1 + $0x1f0] sm:$0xff]   ;;  %v252_v36 = vcombine.low %v1699_v52, %v1702_v53 }
  0x11   :  { %1275 = vmatpush3.bf16.msra.mxu1 %v1401_v15  ;;  %1254 = vmatprep.subr.bf16.mxu0 %v1402_v16  ;;  %v255_v57 = vcombine.high %v228_v49, %v242_v50  ;;  %v254_v59 = vcombine.low %v228_v49, %v242_v50  ;;  %v257_v61 = vcombine.high %v1705_v54, %v1708_v55  ;;  %v1436_v12 = vld [vmem:[%s1877_s1 + $0x108] sm:$0xff]   ;;  %v1438_v16 = vld [vmem:[%s1877_s1 + $0x150] sm:$0xff]  }
  0x12   :  { %1276 = vmatprep.subr.bf16.mxu1 %v1403_v17  ;;  %v278_v62 = vrot.slane %v251_v56, %v1686_v45  ;;  %v264_v0 = vrot.slane %v250_v58, %v1686_v45  ;;  %v285_v4 = vrot.slane %v253_v60, %v1686_v45  ;;  %v1437_v15 = vld [vmem:[%s1877_s1 + $0x188] sm:$0xff]   ;;  %v1439_v17 = vld [vmem:[%s1877_s1 + $0x1d0] sm:$0xff]   ;;  %v256_v37 = vcombine.low %v1705_v54, %v1708_v55 }
  0x13   :  { %v306_v63 = vrot.slane %v255_v57, %v1686_v45  ;;  %v292_v1 = vrot.slane %v254_v59, %v1686_v45  ;;  %v313_v5 = vrot.slane %v257_v61, %v1686_v45  ;;  %v1456_v38 = vld [vmem:[%s1877_s1 + $0x130] sm:$0xff]  }
  0x14   :  { %1255 = vmatpush3.bf16.msra.mxu0 %v1404_v18  ;;  %v1440_v18 = vld [vmem:[%s1877_s1 + $0x110] sm:$0xff]  }
  0x15   :  { %1277 = vmatpush3.bf16.msra.mxu1 %v1405_v19  ;;  %1256 = vmatprep.subr.bf16.mxu0 %v1406_v20  ;;  %v318_v6 = vcombine.low %v278_v62, %v306_v63  ;;  %v319_v7 = vcombine.high %v278_v62, %v306_v63  ;;  %v314_v8 = vcombine.low %v264_v0, %v292_v1  ;;  %v1441_v19 = vld [vmem:[%s1877_s1 + $0x190] sm:$0xff]   ;;  %v1442_v20 = vld [vmem:[%s1877_s1 + $0x158] sm:$0xff]  }
  0x16   :  { %1278 = vmatprep.subr.bf16.mxu1 %v1407_v21  ;;  %v315_v9 = vcombine.high %v264_v0, %v292_v1  ;;  %v320_v13 = vcombine.low %v285_v4, %v313_v5  ;;  %v321_v14 = vcombine.high %v285_v4, %v313_v5  ;;  %v1443_v21 = vld [vmem:[%s1877_s1 + $0x1d8] sm:$0xff]   ;;  %v1457_v39 = vld [vmem:[%s1877_s1 + $0x1b0] sm:$0xff]  }
  0x17   :  { %746 = vmatprep.mubr.bf16.mxu0 %v318_v6  ;;  %787 = vmatprep.mubr.bf16.mxu1 %v319_v7 }
  0x18   :  { %1257 = vmatpush3.bf16.msra.mxu0 %v1408_v22  ;;  %v1444_v22 = vld [vmem:[%s1877_s1 + $0x118] sm:$0xff]  }
  0x19   :  { %1279 = vmatpush3.bf16.msra.mxu1 %v1409_v23  ;;  %1258 = vmatprep.subr.bf16.mxu0 %v1410_v24  ;;  %v1445_v23 = vld [vmem:[%s1877_s1 + $0x198] sm:$0xff]   ;;  %v1446_v24 = vld [vmem:[%s1877_s1 + $0x160] sm:$0xff]  }
  0x1a   :  { %1280 = vmatprep.subr.bf16.mxu1 %v1411_v25  ;;  %v1447_v25 = vld [vmem:[%s1877_s1 + $0x1e0] sm:$0xff]  }
  0x1c   :  { %1259 = vmatpush3.bf16.msra.mxu0 %v1412_v26  ;;  %v1448_v26 = vld [vmem:[%s1877_s1 + $0x120] sm:$0xff]  }
  0x1d   :  { %1281 = vmatpush3.bf16.msra.mxu1 %v1413_v27  ;;  %1260 = vmatprep.subr.bf16.mxu0 %v1414_v28  ;;  %v1449_v27 = vld [vmem:[%s1877_s1 + $0x1a0] sm:$0xff]   ;;  %v1450_v28 = vld [vmem:[%s1877_s1 + $0x168] sm:$0xff]  }
  0x1e   :  { %1282 = vmatprep.subr.bf16.mxu1 %v1415_v29  ;;  %v1451_v29 = vld [vmem:[%s1877_s1 + $0x1e8] sm:$0xff]  }
  0x20   :  { %1261 = vmatpush3.bf16.msra.mxu0 %v1416_v31  ;;  %v1452_v31 = vld [vmem:[%s1877_s1 + $0x128] sm:$0xff]  }
  0x21   :  { %1283 = vmatpush3.bf16.msra.mxu1 %v1417_v32  ;;  %1290 = vmatprep.subr.bf16.mxu0 %v1430_v46  ;;  %v1453_v32 = vld [vmem:[%s1877_s1 + $0x1a8] sm:$0xff]  }
  0x22   :  { %1312 = vmatprep.subr.bf16.mxu1 %v1431_v51 }
  0x23   :  { %747 = vmatmul.mubr.bf16.vlgmr.msra.gmra.mrb[0].mxu0 %v314_v8 }
  0x24   :  { %788 = vmatmul.mubr.bf16.vlgmr.msra.gmra.mrb[0].mxu1 %v315_v9  ;;  %1291 = vmatpush3.bf16.msra.mxu0 %v1432_v2 }
  0x25   :  { %1313 = vmatpush3.bf16.msra.mxu1 %v1433_v3  ;;  %1292 = vmatprep.subr.bf16.mxu0 %v1434_v10 }
  0x26   :  { %1314 = vmatprep.subr.bf16.mxu1 %v1435_v11  ;;  %828 = vmatprep.mubr.bf16.mxu0 %v320_v13 }
  0x27   :  { %869 = vmatprep.mubr.bf16.mxu1 %v321_v14 }
  0x28   :  { %1293 = vmatpush3.bf16.msra.mxu0 %v1436_v12 }
  0x29   :  { %1315 = vmatpush3.bf16.msra.mxu1 %v1437_v15  ;;  %1294 = vmatprep.subr.bf16.mxu0 %v1438_v16 }
  0x2a   :  { %1316 = vmatprep.subr.bf16.mxu1 %v1439_v17 }
  0x2c   :  { %1295 = vmatpush3.bf16.msra.mxu0 %v1440_v18 }
  0x2d   :  { %1317 = vmatpush3.bf16.msra.mxu1 %v1441_v19  ;;  %1296 = vmatprep.subr.bf16.mxu0 %v1442_v20 }
  0x2e   :  { %1318 = vmatprep.subr.bf16.mxu1 %v1443_v21 }
  0x30   :  { %1297 = vmatpush3.bf16.msra.mxu0 %v1444_v22 }
  0x31   :  { %1319 = vmatpush3.bf16.msra.mxu1 %v1445_v23  ;;  %1298 = vmatprep.subr.bf16.mxu0 %v1446_v24 }
  0x32   :  { %1320 = vmatprep.subr.bf16.mxu1 %v1447_v25 }
  0x34   :  { %1299 = vmatpush3.bf16.msra.mxu0 %v1448_v26 }
  0x35   :  { %1321 = vmatpush3.bf16.msra.mxu1 %v1449_v27  ;;  %1300 = vmatprep.subr.bf16.mxu0 %v1450_v28 }
  0x36   :  { %1322 = vmatprep.subr.bf16.mxu1 %v1451_v29 }
  0x38   :  { %1301 = vmatpush3.bf16.msra.mxu0 %v1452_v31 }
  0x39   :  { %1323 = vmatpush3.bf16.msra.mxu1 %v1453_v32 }
  0x3a   :  { %15 = vsyncpa [#allocation4], 0  ;;  %1302 = vmatprep.subr.bf16.mxu0 %v1454_v33  ;;  %1324 = vmatprep.subr.bf16.mxu1 %v1455_v34  ;;  %v1458_v40 = vld [vmem:[%s1877_s1 + $0x178] sm:$0xff]   ;;  %v271_v42 = vrot.slane %v252_v36, %v1686_v45  ;;  %v299_v43 = vrot.slane %v256_v37, %v1686_v45  ;;  %v898_v45 = vld [vmem:[%s1879_s3] sm:$0xff]  ;;  %vm909_vm1 = vcmask 261120   ;;  %vm1155_vm7 = vcmask 130112  }
  0x3b   :  { %v1459_v41 = vld [vmem:[%s1877_s1 + $0x1f8] sm:$0xff]   ;;  %v899_v49 = vld [vmem:[%s1879_s3 + $0x8] sm:$0xff]  ;;  %v900_v51 = vld [vmem:[%s1879_s3 + $0x10] sm:$0xff]  ;;  %vm1158_vm8 = vcmask 122880  }
  0x3c   :  { %1303 = vmatpush3.bf16.msra.mxu0 %v1456_v38  ;;  %v1460_v44 = vld [vmem:[%s1877_s1 + $0x138] sm:$0xff]   ;;  %v316_v47 = vcombine.low %v271_v42, %v299_v43  ;;  %v317_v48 = vcombine.high %v271_v42, %v299_v43  ;;  %v1368_v50 = vpack.c.bf16 %v899_v49, %v898_v45  ;;  %v1174_v56 = vld [vmem:[%s1878_s2] ss:$0 sm:$0xff] }
  0x3d   :  { %1325 = vmatpush3.bf16.msra.mxu1 %v1457_v39  ;;  %v1461_v46 = vld [vmem:[%s1877_s1 + $0x1b8] sm:$0xff]   ;;  %1304 = vmatprep.subr.bf16.mxu0 %v1458_v40  ;;  %v1011_v43 = vld [vmem:[%s1881_s5] sm:$0xff] }
  0x3e   :  { %1326 = vmatprep.subr.bf16.mxu1 %v1459_v41  ;;  %v901_v52 = vld [vmem:[%s1879_s3 + $0x18] sm:$0xff]  ;;  %v1239_v49 = vld [vmem:[%s1880_s4] ss:$0 sm:$0xff] }
  0x3f   :  { %v1372_v53 = vpack.c.bf16 %v901_v52, %v900_v51 }
  0x40   :  { %1305 = vmatpush3.bf16.msra.mxu0 %v1460_v44  ;;  %v1012_v44 = vld [vmem:[%s1881_s5 + $0x8] sm:$0xff] }
  0x41   :  { %1327 = vmatpush3.bf16.msra.mxu1 %v1461_v46  ;;  %1369 = vmatprep.subr.bf16.mxu0 %v1368_v50  ;;  %v1376_v46 = vpack.c.bf16 %v1012_v44, %v1011_v43 }
  0x43   :  { %829 = vmatmul.mubr.bf16.vlgmr.msra.gmra.mrb[4].mxu0 %v316_v47  ;;  %1377 = vmatprep.subr.bf16.mxu1 %v1376_v46  ;;  %v1013_v47 = vld [vmem:[%s1881_s5 + $0x10] sm:$0xff] }
  0x44   :  { %870 = vmatmul.mubr.bf16.vlgmr.msra.gmra.mrb[4].mxu1 %v317_v48  ;;  %1371 = vmatpush3.bf16.msra.mxu0 %v1368_v50  ;;  %v1014_v48 = vld [vmem:[%s1881_s5 + $0x18] sm:$0xff] }
  0x45   :  { %1373 = vmatprep.subr.bf16.mxu0 %v1372_v53  ;;  %1379 = vmatpush3.bf16.msra.mxu1 %v1376_v46  ;;  %v1380_v45 = vpack.c.bf16 %v1014_v48, %v1013_v47 }
  0x47   :  { %1381 = vmatprep.subr.bf16.mxu1 %v1380_v45 }
  0x48   :  { %1375 = vmatpush3.bf16.msra.mxu0 %v1372_v53 }
  0x49   :  { %1383 = vmatpush3.bf16.msra.mxu1 %v1380_v45 }
  0xf6   :  { %v1262_v54 = vpop.f32.mrb[0].mxu0 }
  0xf7   :  { %v1284_v55 = vpop.f32.mrb[0].mxu1  ;;  %v1263_v57 = vpop.f32.mrb[1].mxu0 }
  0xf8   :  { %v1285_v58 = vpop.f32.mrb[1].mxu1  ;;  %v1264_v59 = vadd.f32 %v1263_v57, %v1262_v54  ;;  %v1265_v61 = vpop.f32.mrb[2].mxu0 }
  0xf9   :  { %v1286_v60 = vadd.f32 %v1285_v58, %v1284_v55  ;;  %v1287_v62 = vpop.f32.mrb[2].mxu1  ;;  %v1266_v63 = vpop.f32.mrb[3].mxu0 }
  0xfa   :  { %v1288_v0 = vpop.f32.mrb[3].mxu1  ;;  %v749_v1 = vadd.f32 %v1264_v59, %v1174_v56  ;;  %v1267_v2 = vadd.f32 %v1266_v63, %v1265_v61 }
  0xfb   :  { %v1289_v3 = vadd.f32 %v1288_v0, %v1287_v62 }
  0xfc   :  { %v790_v4 = vadd.f32 %v1286_v60, %v749_v1  ;;  %v752_v5 = vadd.f32 %v1267_v2, %v1174_v56 }
  0xfe   :  { %v793_v6 = vadd.f32 %v1289_v3, %v752_v5 }
 0x116   :  { %v1306_v7 = vpop.f32.mrb[4].mxu0 }
 0x117   :  { %v1328_v8 = vpop.f32.mrb[4].mxu1  ;;  %v1307_v9 = vpop.f32.mrb[5].mxu0 }
 0x118   :  { %v1329_v10 = vpop.f32.mrb[5].mxu1  ;;  %v1308_v11 = vadd.f32 %v1307_v9, %v1306_v7  ;;  %v1309_v13 = vpop.f32.mrb[6].mxu0 }
 0x119   :  { %v1330_v12 = vadd.f32 %v1329_v10, %v1328_v8  ;;  %v1331_v14 = vpop.f32.mrb[6].mxu1  ;;  %v1310_v15 = vpop.f32.mrb[7].mxu0  ;;  %v1242_v8 = vld [vmem:[%s1882_s6] ss:$0 sm:$0xff] }
 0x11a   :  { %v1332_v16 = vpop.f32.mrb[7].mxu1  ;;  %v831_v17 = vadd.f32 %v1308_v11, %v790_v4  ;;  %v1311_v18 = vadd.f32 %v1310_v15, %v1309_v13 }
 0x11b   :  { %v1333_v19 = vadd.f32 %v1332_v16, %v1331_v14 }
 0x11c   :  { %v872_v20 = vadd.f32 %v1330_v12, %v831_v17  ;;  %v834_v21 = vadd.f32 %v1311_v18, %v793_v6 }
 0x11e   :  { %v878_v22 = vand.u32 2147483647, %v872_v20  ;;  %v875_v23 = vadd.f32 %v1333_v19, %v834_v21  ;;  %vm890_vm0 = vcmp.ge.f32.partialorder %v872_v20, 0.0 }
 0x120   :  { %v880_v24 = vsub.f32 0.0, %v878_v22  ;;  %v879_v25 = vand.u32 2147483647, %v875_v23  ;;  %vm891_vm2 = vcmp.ge.f32.partialorder %v875_v23, 0.0 }
 0x122   :  { %v882_v26 = vmul.f32 1.442695, %v880_v24  ;;  %v881_v27 = vsub.f32 0.0, %v879_v25 }
 0x124   :  { %1462 = vpow2.f32 %v882_v26  ;;  %v884_v28 = vmul.f32 1.442695, %v881_v27 }
 0x126   :  { %1464 = vpow2.f32 %v884_v28 }
 0x12e   :  { %v1463_v29 = vpop.eup %1462 }
 0x12f   :  { %v886_v31 = vadd.f32 1.0, %v1463_v29  ;;  %v1245_v29 = vld [vmem:[%s1883_s7] ss:$0 sm:$0xff]  ;;  %s1511_s7 = smov [#allocation3]  }
 0x130   :  { %v1465_v32 = vpop.eup %1464  ;;  %s1166_s22 = sshll.u32 %s1511_s7, 4  ;;  %s1167_s22 = int_to_ptr.vmem [resolvable:$true] %s1166_s22 }
 0x131   :  { %1466 = vrcp.f32 %v886_v31  ;;  %v887_v33 = vadd.f32 1.0, %v1465_v32  ;;  %s1486_s23 = scalar_lea.vmem %s1167_s22, 16  ;;  %p1491_p1 = scmp.lt.s32.totalorder %s1167_s22, %s1167_s22 }
 0x132   :  { %p1487_p0 = scmp.ne.s32.totalorder %s1167_s22, %s1486_s23 }
 0x133   :  { %1468 = vrcp.f32 %v887_v33 }
 0x13b   :  { %v1467_v34 = vpop.eup %1466 }
 0x13c   :  { %v892_v36 = vsub.f32 1.0, %v1467_v34 }
 0x13d   :  { %v1469_v37 = vpop.eup %1468 }
 0x13e   :  { %v894_v38 = vsel %vm890_vm0, %v1467_v34, %v892_v36  ;;  %v893_v39 = vsub.f32 1.0, %v1469_v37 }
 0x13f   :  { %v896_v40 = vmul.f32 %v894_v38, %v872_v20  ;;  %v1145_v38 = vand.u32 127, %v197_v30 }
 0x140   :  { %v895_v41 = vsel %vm891_vm2, %v1469_v37, %v893_v39 }
 0x141   :  { %v897_v42 = vmul.f32 %v895_v41, %v875_v23  ;;  %1354 = vmatprep.mubr.msk.f32.mxu0 %vm909_vm1, %v896_v40  ;;  %v1150_v39 = vadd.s32 4294967288, %v1145_v38  ;;  %v1139_v40 = vstv %s1884_s8  ;;  %s1490_s8 = scalar_lea.vmem %s1167_s22, 32 }
 0x142   :  { %p1492_p2 = scmp.lt.s32.totalorder %s1490_s8, %s1486_s23 }
 0x143   :  { %1355 = vmatmul.mubr.msk.f32.vlgmr.msra.gmra.mrb[8].mxu0 %vm909_vm1, %v897_v42  ;;  %v1148_v42 = vsub.s32 %v1145_v38, %v1659_v35  ;;  %v1153_v44 = vsub.s32 %v1150_v39, %v1659_v35 }
 0x144   :  { %p1493_p3 = por %p1492_p2, %p1491_p1 }
 0x146   :  { %p1494_p4 = pnand %p1493_p3, %p1487_p0 }
 0x216   :  { %v1356_v50 = vpop.f32.mrb[8].mxu0 }
 0x217   :  { %v988_v51 = vadd.f32 %v1356_v50, %v1239_v49  ;;  %v982_v52 = vpop.f32.mrb[9].mxu0 }
 0x218   :  { %v983_v53 = vadd.f32 %v1239_v49, %v982_v52 }
 0x219   :  { %v992_v54 = vand.u32 2147483647, %v988_v51  ;;  %vm1004_vm3 = vcmp.ge.f32.partialorder %v988_v51, 0.0 }
 0x21a   :  { %v991_v55 = vand.u32 2147483647, %v983_v53  ;;  %vm1003_vm4 = vcmp.ge.f32.partialorder %v983_v53, 0.0 }
 0x21b   :  { %v994_v56 = vsub.f32 0.0, %v992_v54 }
 0x21c   :  { %v993_v57 = vsub.f32 0.0, %v991_v55 }
 0x21d   :  { %v997_v58 = vmul.f32 1.442695, %v994_v56 }
 0x21e   :  { %v995_v59 = vmul.f32 1.442695, %v993_v57 }
 0x21f   :  { %1470 = vpow2.f32 %v997_v58 }
 0x220   :  { %1472 = vpow2.f32 %v995_v59 }
 0x229   :  { %v1471_v60 = vpop.eup %1470 }
 0x22a   :  { %v1473_v61 = vpop.eup %1472  ;;  %v1000_v62 = vadd.f32 1.0, %v1471_v60 }
 0x22b   :  { %v999_v63 = vadd.f32 1.0, %v1473_v61 }
 0x22c   :  { %1474 = vrcp.f32 %v1000_v62 }
 0x22d   :  { %1476 = vrcp.f32 %v999_v63 }
 0x236   :  { %v1475_v0 = vpop.eup %1474 }
 0x237   :  { %v1477_v1 = vpop.eup %1476  ;;  %v1006_v2 = vsub.f32 1.0, %v1475_v0 }
 0x238   :  { %v1005_v3 = vsub.f32 1.0, %v1477_v1 }
 0x239   :  { %v1008_v4 = vsel %vm1004_vm3, %v1475_v0, %v1006_v2 }
 0x23a   :  { %v1007_v5 = vsel %vm1003_vm4, %v1477_v1, %v1005_v3  ;;  %v1010_v7 = vmul.f32 %v1008_v4, %v988_v51 }
 0x23b   :  { %v1009_v6 = vmul.f32 %v1007_v5, %v983_v53 }
 0x23d   :  { %1365 = vmatprep.mubr.msk.f32.mxu1 %vm909_vm1, %v1009_v6 }
 0x23e   :  { %1366 = vmatmul.mubr.msk.f32.vlgmr.msra.gmra.mrb[8].mxu1 %vm909_vm1, %v1010_v7 }
 0x311   :  { %v1367_v9 = vpop.f32.mrb[8].mxu1 }
 0x312   :  { %v1100_v10 = vadd.f32 %v1367_v9, %v1242_v8  ;;  %v1094_v11 = vpop.f32.mrb[9].mxu1 }
 0x313   :  { %v1095_v12 = vadd.f32 %v1242_v8, %v1094_v11 }
 0x314   :  { %v1104_v13 = vand.u32 2147483647, %v1100_v10  ;;  %vm1116_vm5 = vcmp.ge.f32.partialorder %v1100_v10, 0.0 }
 0x315   :  { %v1103_v14 = vand.u32 2147483647, %v1095_v12  ;;  %vm1115_vm6 = vcmp.ge.f32.partialorder %v1095_v12, 0.0 }
 0x316   :  { %v1106_v15 = vsub.f32 0.0, %v1104_v13 }
 0x317   :  { %v1105_v16 = vsub.f32 0.0, %v1103_v14 }
 0x318   :  { %v1109_v17 = vmul.f32 1.442695, %v1106_v15 }
 0x319   :  { %v1107_v18 = vmul.f32 1.442695, %v1105_v16 }
 0x31a   :  { %1478 = vpow2.f32 %v1109_v17 }
 0x31b   :  { %1480 = vpow2.f32 %v1107_v18 }
 0x324   :  { %v1479_v19 = vpop.eup %1478 }
 0x325   :  { %v1481_v20 = vpop.eup %1480  ;;  %v1112_v21 = vadd.f32 1.0, %v1479_v19 }
 0x326   :  { %v1111_v22 = vadd.f32 1.0, %v1481_v20 }
 0x327   :  { %1482 = vrcp.f32 %v1112_v21 }
 0x328   :  { %1484 = vrcp.f32 %v1111_v22 }
 0x331   :  { %v1483_v23 = vpop.eup %1482 }
 0x332   :  { %v1485_v24 = vpop.eup %1484  ;;  %v1118_v25 = vsub.f32 1.0, %v1483_v23 }
 0x333   :  { %v1117_v26 = vsub.f32 1.0, %v1485_v24 }
 0x334   :  { %v1120_v27 = vsel %vm1116_vm5, %v1483_v23, %v1118_v25 }
 0x335   :  { %v1119_v28 = vsel %vm1115_vm6, %v1485_v24, %v1117_v26  ;;  %v1122_v32 = vmul.f32 %v1120_v27, %v1100_v10 }
 0x336   :  { %v1121_v31 = vmul.f32 %v1119_v28, %v1095_v12 }
 0x337   :  { %v1131_v36 = vmul.f32 %v1245_v29, %v1122_v32 }
 0x338   :  { %v1130_v33 = vmul.f32 %v1245_v29, %v1121_v31 }
 0x339   :  { %v1135_v37 = vsel %vm909_vm1, %v1131_v36, 0.0 }
 0x33a   :  { %v1132_v34 = vsel %vm909_vm1, %v1130_v33, 0.0 }
 0x33b   :  { %1133 = vadd.xlane.f32.xlu0 %v1132_v34 }
 0x33f   :  { %1136 = vadd.xlane.f32.xlu0 %v1135_v37 }
 0x3c8   :  { %v1134_v41 = vpop.xlane.xlu0 %1133 }
 0x3c9   :  { %v1140_v43 = vadd.f32 %v1139_v40, %v1134_v41 }
 0x3cb   :  { %v1149_v48 = vrot.slane %v1140_v43, %v1148_v42 }
 0x3cc   :  { %v1137_v46 = vpop.xlane.xlu0 %1136 }
 0x3cd   :  { %v1141_v47 = vadd.f32 %v1139_v40, %v1137_v46 }
 0x3cf   :  { %v1154_v45 = vrot.slane %v1141_v47, %v1153_v44 }
 0x3d1   :  { %v1156_v30 = vsel %vm1155_vm7, %v1154_v45, %v1149_v48 }
 0x3d2   :  { %1159 = vst.msk [vmem:[#allocation3] sm:$0x1] %vm1158_vm8, %v1156_v30 }
 0x3d3   :  { %1497 = shalt.err (!%p1494_p4)
}
 0x3d4   :  { %s1498_s26 = scalar_lea.hbm %s1885_s9, 16 }
 0x3d5   :  { %p1499_p5 = scmp.ne.s32.totalorder %s1885_s9, %s1498_s26  ;;  %p1502_p6 = scmp.lt.u32.totalorder %s1498_s26, %s1885_s9 }
 0x3d7   :  { %p1504_p7 = pnand %p1502_p6, %p1499_p5 }
 0x3d9   :  { %1507 = shalt.err (!%p1504_p7)
}
 0x3da   :  { %1169 = dma.vmem_to_hbm [thread:$0]  %s1167_s22, 16, %s1885_s9, [#allocation4]  }
 0x3db   :  { %1508 = dma.done.wait [#allocation4], 16  }
 0x3dc   :  { %1509 = vsyncadd [#allocation4], 4294967280 }
 0x3dd   :  { %1173 = vsyncpa [#allocation4], 1 }

</bundles_post_ra>
